<compile_context>
chip_gen: v5e
topology: v5e:2x2
jax: 0.10.0
libtpu: 0.0.40
codegen_flags: <defaults>
</compile_context>

<pallas_src>
import numpy as np
from functools import partial

import jax
import jax.numpy as jnp
from jax.experimental import pallas as pl
from jax.experimental.pallas import tpu as pltpu

# ---------------------------------------------------------------------------
# Synthetic OFDM / stream-management configuration (deterministic, in-script)
# ---------------------------------------------------------------------------
B = 2                     # batch size
NUM_RX = 2
NUM_RX_ANT = 4
NUM_TX = 2
NUM_STREAMS_PER_TX = 1
NUM_OFDM_SYMBOLS = 8
FFT_SIZE = 16
EFF_SC = np.arange(2, 14, dtype=np.int32)      # 12 effective subcarriers
NUM_EFF_SC = EFF_SC.size
PILOT_OFDM_SYMBOL = 2                          # one full pilot OFDM symbol
NUM_BITS_PER_SYMBOL = 2                        # QPSK
NUM_POINTS = 2 ** NUM_BITS_PER_SYMBOL
OUTPUT = "symbol"                              # "symbol" or "bit"


def build_config():
    # Pilot-pattern mask over the effective grid: 1 = pilot, 0 = data
    mask = np.zeros((NUM_TX, NUM_STREAMS_PER_TX, NUM_OFDM_SYMBOLS, NUM_EFF_SC),
                    np.int32)
    mask[:, :, PILOT_OFDM_SYMBOL, :] = 1
    num_data = int((mask[0, 0] == 0).sum())
    flat = mask.reshape(-1, NUM_OFDM_SYMBOLS * NUM_EFF_SC)
    # stable sort by (mask value, index): data positions first, ascending index
    data_ind = np.stack([
        np.array(sorted(range(flat.shape[-1]), key=lambda x: (int(flat[i, x]), x)),
                 dtype=np.int32)
        for i in range(flat.shape[0])
    ]).reshape(NUM_TX, NUM_STREAMS_PER_TX, -1)[..., :num_data]

    # Stream management: rx r detects tx r; the other tx is interference
    assoc = np.eye(NUM_RX, NUM_TX, dtype=bool)
    num_streams_per_rx = NUM_TX * NUM_STREAMS_PER_TX // NUM_RX
    desired, undesired, detected_pairs, desired_map = [], [], [], []
    for r in range(NUM_RX):
        dmap_r = []
        for tx in range(NUM_TX):
            for s in range(NUM_STREAMS_PER_TX):
                idx = (r * NUM_TX + tx) * NUM_STREAMS_PER_TX + s
                if assoc[r, tx]:
                    desired.append(idx)
                    detected_pairs.append((tx, s))
                    dmap_r.append(tx * NUM_STREAMS_PER_TX + s)
                else:
                    undesired.append(idx)
        desired_map.append(dmap_r)
    stream_ind = np.array(
        [detected_pairs.index((tx, s))
         for tx in range(NUM_TX) for s in range(NUM_STREAMS_PER_TX)],
        dtype=np.int32)

    # Deterministic QPSK constellation
    points = (np.array([1 + 1j, 1 - 1j, -1 + 1j, -1 - 1j], np.complex64)
              / np.sqrt(2.0)).astype(np.complex64)

    return dict(
        eff_sc=EFF_SC,
        data_ind=data_ind,
        num_data=num_data,
        desired_ind=np.array(desired, np.int32),
        undesired_ind=np.array(undesired, np.int32),
        stream_ind=stream_ind,
        desired_stream_map=desired_map,
        num_streams_per_rx=num_streams_per_rx,
        points=jnp.asarray(points),
    )


# ---------------------------------------------------------------------------
# Hermitian-packed covariance layout helpers
# ---------------------------------------------------------------------------
def _upper_pairs(A):
    re_pairs = [(i, j) for i in range(A) for j in range(i, A)]       # incl diag
    im_pairs = [(i, j) for i in range(A) for j in range(i + 1, A)]   # strict
    diag_pos, p = [], 0
    for i in range(A):
        diag_pos.append(p)
        p += A - i
    return re_pairs, im_pairs, diag_pos


# ---------------------------------------------------------------------------
# Pallas kernel: Hermitian-packed noise-plus-interference covariance + trace
# ---------------------------------------------------------------------------
def _cov_kernel(x_ref, out_ref, *, A, U):
    # x_ref  : [2*U*A + A, NT] f32
    #          rows [u*A + a]        = Re(H_und[a, u])
    #          rows [U*A + u*A + a]  = Im(H_und[a, u])
    #          rows [2*U*A + a]      = diag term  no + sum_{tx,s} err_var
    # out_ref: [A(A+1)/2 + A(A-1)/2 + 1, NT] f32
    #          rows 0..n_re-1         : Re(S[i,j]), (i,j) upper tri incl diag
    #          rows n_re..n_re+n_im-1 : Im(S[i,j]), (i,j) strict upper tri
    #          last row               : trace(S)   (real)
    NT = x_ref.shape[-1]
    UA = U * A
    n_re = A * (A + 1) // 2
    n_im = A * (A - 1) // 2
    _, _, diag_pos = _upper_pairs(A)

    x = x_ref[...]                        # one dense [2*U*A + A, NT] load
    d = x[2 * UA:2 * UA + A, :]           # [A, NT] diagonal term

    if U == 0:
        re_acc = jnp.zeros((n_re, NT), jnp.float32)
        im_acc = jnp.zeros((n_im, NT), jnp.float32) if n_im else None
    else:
        re_acc = None
        im_acc = None
        for u in range(U):
            hr = x[u * A:(u + 1) * A, :]              # Re(H[:, u])  [A, NT]
            hi = x[UA + u * A:UA + (u + 1) * A, :]    # Im(H[:, u])  [A, NT]
            # upper triangle (incl. diagonal): row i against rows i..A-1
            l_re = jnp.concatenate(
                [jnp.broadcast_to(hr[i:i + 1, :], (A - i, NT)) for i in range(A)],
                axis=0)
            l_im = jnp.concatenate(
                [jnp.broadcast_to(hi[i:i + 1, :], (A - i, NT)) for i in range(A)],
                axis=0)
            r_re = jnp.concatenate([hr[i:, :] for i in range(A)], axis=0)
            r_im = jnp.concatenate([hi[i:, :] for i in range(A)], axis=0)
            t_re = l_re * r_re + l_im * r_im          # [n_re, NT]
            re_acc = t_re if re_acc is None else re_acc + t_re
            if n_im:
                l2_re = jnp.concatenate(
                    [jnp.broadcast_to(hr[i:i + 1, :], (A - 1 - i, NT))
                     for i in range(A - 1)], axis=0)
                l2_im = jnp.concatenate(
                    [jnp.broadcast_to(hi[i:i + 1, :], (A - 1 - i, NT))
                     for i in range(A - 1)], axis=0)
                r2_re = jnp.concatenate([hr[i + 1:, :] for i in range(A - 1)],
                                        axis=0)
                r2_im = jnp.concatenate([hi[i + 1:, :] for i in range(A - 1)],
                                        axis=0)
                t_im = l2_im * r2_re - l2_re * r2_im  # [n_im, NT]
                im_acc = t_im if im_acc is None else im_acc + t_im

    # hoisted diagonal add: one [n_re, NT] tile with d[a] at the packed
    # diagonal rows (positions diag_pos), zeros elsewhere
    diag_segs = []
    for a in range(A):
        diag_segs.append(d[a:a + 1, :])
        if A - 1 - a:
            diag_segs.append(jnp.zeros((A - 1 - a, NT), jnp.float32))
    re_out = re_acc + jnp.concatenate(diag_segs, axis=0)

    # fused trace = sum of the packed diagonal rows (diag term included)
    tr = re_out[diag_pos[0]:diag_pos[0] + 1, :]
    for a in range(1, A):
        tr = tr + re_out[diag_pos[a]:diag_pos[a] + 1, :]

    parts = [re_out]
    if n_im:
        parts.append(im_acc)
    parts.append(tr)
    out_ref[...] = jnp.concatenate(parts, axis=0)     # one lane-dense store


# ---------------------------------------------------------------------------
# Tiling: pad N up to a multiple of the chosen tile; guarantee >= 2 grid steps
# ---------------------------------------------------------------------------
_LANE = 128
_MAX_TILE = 8192   # (12+17) rows * 8192 * 4 B * 2 (double-buffer) ~= 1.9 MiB


def _tiling(N, max_tile=_MAX_TILE):
    n128 = -(-N // _LANE) * _LANE
    if n128 <= _LANE:
        return int(n128), int(n128)               # nothing to split
    # cap NT at ~half the problem so the "parallel" axis always has >= 2 steps
    # (lets Mosaic shard across v7x's two TensorCores) and at max_tile to
    # bound VMEM; then pad N UP to a multiple of the tile (no divisor search).
    half = -(-(n128 // 2) // _LANE) * _LANE
    nt = int(min(max_tile, max(_LANE, half)))
    n_pad = int(-(-n128 // nt) * nt)
    return nt, n_pad


def covariance_pallas(x_packed, A, U):
    # x_packed: [2*U*A + A, N] f32  ->  [n_re + n_im + 1, N] f32
    rows_in, N = x_packed.shape
    assert rows_in == 2 * U * A + A
    n_re = A * (A + 1) // 2
    n_im = A * (A - 1) // 2
    rows_out = n_re + n_im + 1

    NT, N_pad = _tiling(N)
    if N_pad != N:
        x_packed = jnp.pad(x_packed, ((0, 0), (0, N_pad - N)))
    grid = (N_pad // NT,)

    flops = int(N_pad) * (U * 3 * (n_re + n_im) + n_re + A)
    bytes_accessed = (rows_in + rows_out) * int(N_pad) * 4

    out = pl.pallas_call(
        partial(_cov_kernel, A=A, U=U),
        out_shape=jax.ShapeDtypeStruct((rows_out, N_pad), jnp.float32),
        grid_spec=pltpu.PrefetchScalarGridSpec(
            num_scalar_prefetch=0,
            grid=grid,
            in_specs=[pl.BlockSpec((rows_in, NT), lambda n: (0, n))],
            out_specs=pl.BlockSpec((rows_out, NT), lambda n: (0, n)),
        ),
        compiler_params=pltpu.CompilerParams(
            dimension_semantics=("parallel",),
            vmem_limit_bytes=32 * 1024 * 1024),
        cost_estimate=pl.CostEstimate(
            flops=flops, transcendentals=0, bytes_accessed=bytes_accessed),
    )(x_packed)

    if N_pad != N:
        out = out[:, :N]
    return out


def unpack_covariance(s_packed, A, batch_shape):
    # Rebuild the full complex covariance [*batch_shape, A, A] from the
    # Hermitian-packed kernel output.  NOT on the hot path: only needed for a
    # user-supplied detector that consumes full S, and for the sanity check.
    re_pairs, im_pairs, _ = _upper_pairs(A)
    n_re = len(re_pairs)
    Npts = s_packed.shape[-1]
    re_full = jnp.zeros((A, A, Npts), jnp.float32)
    im_full = jnp.zeros((A, A, Npts), jnp.float32)
    for r, (i, j) in enumerate(re_pairs):
        re_full = re_full.at[i, j].set(s_packed[r])
        if i != j:
            re_full = re_full.at[j, i].set(s_packed[r])
    for r, (i, j) in enumerate(im_pairs):
        im_full = im_full.at[i, j].set(s_packed[n_re + r])
        im_full = im_full.at[j, i].set(-s_packed[n_re + r])
    s = (re_full + 1j * im_full).astype(jnp.complex64)
    s = s.reshape((A, A) + tuple(batch_shape))
    nd = len(batch_shape)
    return jnp.transpose(s, tuple(range(2, 2 + nd)) + (0, 1))   # [..., A, A]


# ---------------------------------------------------------------------------
# Forward pass (preprocess -> detector -> extract), mirroring the torch module
# ---------------------------------------------------------------------------
def preprocess_inputs(y, h_hat, prior, err_var, no, cfg):
    Bsz = y.shape[0]
    R, A = NUM_RX, NUM_RX_ANT
    Tn, Fn = NUM_OFDM_SYMBOLS, NUM_EFF_SC
    K = cfg["num_streams_per_rx"]

    # ---- received signal: remove nulled subcarriers, permute ----
    y_eff = y[..., cfg["eff_sc"]]                                   # [B,R,A,T,F]
    y_dt = jnp.transpose(y_eff, (0, 1, 3, 4, 2)).astype(jnp.complex64)  # [B,R,T,F,A]

    # ---- channel estimates: desired / undesired split ----
    h_dt = jnp.transpose(h_hat, (1, 3, 4, 0, 2, 5, 6))    # [R,Tx,S,B,A,T,F]
    h_dt = h_dt.reshape((-1,) + h_dt.shape[3:])           # [R*Tx*S,B,A,T,F]
    h_des = h_dt[cfg["desired_ind"]].reshape((R, K) + h_dt.shape[1:])
    h_und = h_dt[cfg["undesired_ind"]].reshape((R, -1) + h_dt.shape[1:])
    perm = (2, 0, 4, 5, 3, 1)
    h_des = jnp.transpose(h_des, perm).astype(jnp.complex64)   # [B,R,T,F,A,K]
    h_und = jnp.transpose(h_und, perm).astype(jnp.complex64)   # [B,R,T,F,A,U]
    U = h_und.shape[-1]
    N = Bsz * R * Tn * Fn

    # ---- pack Re/Im of H_undesired + the per-antenna diagonal term into one
    #      [2*U*A + A, N] f32 slab (single input DMA per kernel step) ----
    h_t = jnp.transpose(h_und, (5, 4, 0, 1, 2, 3)).reshape(U * A, N)
    # diag term = no + sum over ALL (tx, stream) of err_var, exactly as in the
    # torch reference (err_var.expand_as(h_hat), permuted, summed over streams)
    ev_b = jnp.broadcast_to(jnp.real(err_var).astype(jnp.float32), h_hat.shape)
    ev_sum = jnp.sum(ev_b, axis=(3, 4))                        # [B,R,A,T,F]
    no_b = jnp.broadcast_to(no.astype(jnp.float32)[:, :, :, None, None],
                            (Bsz, R, A, Tn, Fn))               # [B,R,A,T,F]
    diag = jnp.transpose(ev_sum + no_b, (2, 0, 1, 3, 4)).reshape(A, N)
    x_packed = jnp.concatenate(
        [jnp.real(h_t).astype(jnp.float32),
         jnp.imag(h_t).astype(jnp.float32),
         diag], axis=0)                                        # [2*U*A + A, N]

    # ---- covariance S (Hermitian-packed) + fused trace via the Pallas kernel
    s_packed = covariance_pallas(x_packed, A, U)               # [n_re+n_im+1, N]
    n_re = A * (A + 1) // 2
    n_im = A * (A - 1) // 2
    s_tr = s_packed[n_re + n_im].reshape(Bsz, R, Tn, Fn)[..., None]  # [B,R,T,F,1]
    # The full complex S is never materialized on the hot path; a detector
    # needing it can call unpack_covariance(s_packed, A, (B, R, T, F)).

    # ---- scatter the prior onto the resource grid ----
    P = prior.shape[-1]
    prior = prior.reshape(prior.shape[0], prior.shape[1], prior.shape[2], -1, P)
    prior_p = jnp.transpose(prior, (1, 2, 3, 4, 0))       # [Tx,S,Nd,P,B]
    prior_flat = prior_p.reshape(NUM_TX * NUM_STREAMS_PER_TX, -1, P, Bsz)
    # TODO(synk): the torch code uses `torch.where(...).expand_as` + `scatter_`,
    # which is not executable as written; we reproduce the intended Sionna
    # semantics (place prior rows at the data-RE positions of the grid).
    tmpl = jnp.zeros((NUM_TX * NUM_STREAMS_PER_TX, Tn * Fn, P, Bsz), jnp.float32)
    rows = np.arange(NUM_TX * NUM_STREAMS_PER_TX)[:, None]
    di = cfg["data_ind"].reshape(NUM_TX * NUM_STREAMS_PER_TX, -1)
    tmpl = tmpl.at[rows, di].set(prior_flat.astype(jnp.float32))
    tmpl = tmpl.reshape(NUM_TX, NUM_STREAMS_PER_TX, Tn, Fn, P, Bsz)
    pr = jnp.transpose(tmpl, (5, 2, 3, 0, 1, 4))          # [B,T,F,Tx,S,P]
    pr = pr.reshape(Bsz, Tn, Fn, NUM_TX * NUM_STREAMS_PER_TX, P)
    pr = jnp.broadcast_to(pr[:, None],
                          (Bsz, R, Tn, Fn, NUM_TX * NUM_STREAMS_PER_TX, P))

    return y_dt, h_des, pr, s_tr, s_packed, h_und


def mf_detector_with_prior(inputs, points, desired_stream_map):
    # Synthetic plugin detector (the original module takes `detector` as a
    # user-supplied callable): matched filter + distance-to-constellation
    # logits combined with the prior of the detected streams.  It consumes the
    # kernel's fused trace(S) directly (no second pass over the covariance).
    y, h, prior, s_tr = inputs
    x_mf = jnp.einsum("...ak,...a->...k", jnp.conj(h), y)      # [B,R,T,F,K]
    h2 = jnp.sum(jnp.abs(h) ** 2, axis=-2)                     # [B,R,T,F,K]
    x_hat = x_mf / (h2 + 1e-9)
    snr = h2 / (s_tr / h.shape[-2] + 1e-9)                     # s_tr: [B,R,T,F,1]
    pts = points.reshape((1,) * x_hat.ndim + (-1,))
    d = -jnp.abs(x_hat[..., None] - pts) ** 2 * snr[..., None]  # [B,R,T,F,K,P]
    R = y.shape[1]
    prior_des = jnp.stack(
        [prior[:, r][:, :, :, desired_stream_map[r], :] for r in range(R)],
        axis=1)                                                  # [B,R,T,F,K,P]
    return (d + prior_des).astype(jnp.float32)


def extract_datasymbols(z, cfg):
    # z: [B,R,T,F,K,P]
    rank_extended = z.ndim < 6
    z = jnp.transpose(z, (1, 4, 2, 3, 5, 0))              # [R,K,T,F,P,B]
    z = z.reshape((-1,) + z.shape[2:])                    # [R*K,T,F,P,B]
    z = z[cfg["stream_ind"]]
    z = z.reshape((NUM_TX, NUM_STREAMS_PER_TX) + z.shape[1:])
    z = z.reshape(z.shape[:2] + (-1,) + z.shape[4:])      # [Tx,S,T*F,P,B]
    di = cfg["data_ind"][:, :, :, None, None]
    z = jnp.take_along_axis(z, di, axis=2)                # [Tx,S,Nd,P,B]
    z = jnp.transpose(z, (4, 0, 1, 2, 3))                 # [B,Tx,S,Nd,P]
    if OUTPUT == "bit":
        z = z.reshape(z.shape[:3] + (-1,))
    if rank_extended:
        z = jnp.squeeze(z, -1)
    return z


def ofdm_detector_with_prior_forward(inputs, cfg):
    y, h_hat, prior, err_var, no = inputs
    y_dt, h_des, pr, s_tr, _, _ = preprocess_inputs(y, h_hat, prior, err_var,
                                                    no, cfg)
    z = mf_detector_with_prior([y_dt, h_des, pr, s_tr], cfg["points"],
                               cfg["desired_stream_map"])
    z = extract_datasymbols(z, cfg)
    return z


# ---------------------------------------------------------------------------
if __name__ == "__main__":
    cfg = build_config()
    key = jax.random.PRNGKey(0)
    k = jax.random.split(key, 6)

    y = (jax.random.normal(k[0], (B, NUM_RX, NUM_RX_ANT, NUM_OFDM_SYMBOLS, FFT_SIZE))
         + 1j * jax.random.normal(k[1], (B, NUM_RX, NUM_RX_ANT, NUM_OFDM_SYMBOLS,
                                         FFT_SIZE))).astype(jnp.complex64)
    h_hat = (jax.random.normal(
                 k[2], (B, NUM_RX, NUM_RX_ANT, NUM_TX, NUM_STREAMS_PER_TX,
                        NUM_OFDM_SYMBOLS, NUM_EFF_SC))
             + 1j * jax.random.normal(
                 k[3], (B, NUM_RX, NUM_RX_ANT, NUM_TX, NUM_STREAMS_PER_TX,
                        NUM_OFDM_SYMBOLS, NUM_EFF_SC))).astype(jnp.complex64)
    err_var = 0.01 * jnp.ones((1, 1, 1, NUM_TX, NUM_STREAMS_PER_TX, 1, 1),
                              jnp.float32)
    no = 0.1 * jnp.ones((B, NUM_RX, NUM_RX_ANT), jnp.float32)
    prior = jax.random.normal(
        k[4], (B, NUM_TX, NUM_STREAMS_PER_TX, cfg["num_data"], NUM_POINTS),
        jnp.float32)

    # ---- sanity check of the Pallas covariance against an INDEPENDENT
    #      pure-JAX reference built straight from the raw inputs (torch path)
    y_dt, h_des, pr, s_tr, s_packed, h_und = preprocess_inputs(
        y, h_hat, prior, err_var, no, cfg)
    A = NUM_RX_ANT
    s_full = unpack_covariance(s_packed, A,
                               (B, NUM_RX, NUM_OFDM_SYMBOLS, NUM_EFF_SC))

    err_var_dt = jnp.broadcast_to(err_var, h_hat.shape)            # [B,R,A,Tx,S,T,F]
    err_var_dt = jnp.transpose(err_var_dt, (0, 1, 5, 6, 2, 3, 4))  # [B,R,T,F,A,Tx,S]
    err_var_dt = err_var_dt.reshape(err_var_dt.shape[:5] + (-1,))  # [B,R,T,F,A,Tx*S]
    s_csi = jnp.sum(err_var_dt, axis=-1)                           # [B,R,T,F,A]
    no_dt = jnp.broadcast_to(no, y.shape[:3])                      # [B,R,A]
    no_dt = jnp.broadcast_to(
        no_dt[:, :, None, None, :],
        (B, NUM_RX, NUM_OFDM_SYMBOLS, NUM_EFF_SC, A))              # [B,R,T,F,A]
    s_ref = jnp.matmul(h_und, jnp.conj(jnp.swapaxes(h_und, -1, -2)))
    eye = jnp.eye(A, dtype=jnp.complex64)
    s_ref = s_ref + eye * (no_dt + s_csi).astype(jnp.complex64)[..., None, :]

    np.testing.assert_allclose(np.asarray(s_full), np.asarray(s_ref),
                               rtol=1e-4, atol=1e-4)
    np.testing.assert_allclose(
        np.asarray(s_tr[..., 0]),
        np.asarray(jnp.real(jnp.einsum("...ii->...", s_ref))),
        rtol=1e-4, atol=1e-4)

    z = ofdm_detector_with_prior_forward((y, h_hat, prior, err_var, no), cfg)
    z = jax.block_until_ready(z)
    assert z.shape == (B, NUM_TX, NUM_STREAMS_PER_TX, cfg["num_data"], NUM_POINTS)
    assert z.dtype == jnp.float32
    print("KERNEL_OK")
</pallas_src>

<mosaic_0001>
module attributes {stable_mosaic.version = 11 : i64} {
  func.func @_cov_kernel(%arg0: i32, %arg1: memref<12x256xf32, #tpu.memory_space<vmem>>, %arg2: memref<17x256xf32, #tpu.memory_space<vmem>>) attributes {dimension_semantics = [#tpu.dimension_semantics<parallel>], iteration_bounds = array<i64: 2>, scalar_prefetch = 0 : i64, scratch_operands = 0 : i64, tpu.core_type = #tpu.core_type<tc>, window_params = [{transform_indices = @transform_0, window_bounds = array<i64: 12, 256>}, {transform_indices = @transform_1, window_bounds = array<i64: 17, 256>}]} {
    %c0 = arith.constant 0 : index
    %c0_0 = arith.constant 0 : index
    %0 = vector.load %arg1[%c0, %c0_0] : memref<12x256xf32, #tpu.memory_space<vmem>>, vector<12x256xf32>
    %1 = vector.extract_strided_slice %0 {offsets = [8, 0], sizes = [4, 256], strides = [1, 1]} : vector<12x256xf32> to vector<4x256xf32>
    %2 = vector.extract_strided_slice %0 {offsets = [0, 0], sizes = [4, 256], strides = [1, 1]} : vector<12x256xf32> to vector<4x256xf32>
    %3 = vector.extract_strided_slice %0 {offsets = [4, 0], sizes = [4, 256], strides = [1, 1]} : vector<12x256xf32> to vector<4x256xf32>
    %4 = vector.extract_strided_slice %2 {offsets = [0, 0], sizes = [1, 256], strides = [1, 1]} : vector<4x256xf32> to vector<1x256xf32>
    %5 = vector.shape_cast %4 : vector<1x256xf32> to vector<1x256xf32>
    %6 = vector.broadcast %5 : vector<1x256xf32> to vector<4x256xf32>
    %7 = vector.extract_strided_slice %2 {offsets = [1, 0], sizes = [1, 256], strides = [1, 1]} : vector<4x256xf32> to vector<1x256xf32>
    %8 = vector.shape_cast %7 : vector<1x256xf32> to vector<1x256xf32>
    %9 = vector.broadcast %8 : vector<1x256xf32> to vector<3x256xf32>
    %10 = vector.extract_strided_slice %2 {offsets = [2, 0], sizes = [1, 256], strides = [1, 1]} : vector<4x256xf32> to vector<1x256xf32>
    %11 = vector.shape_cast %10 : vector<1x256xf32> to vector<1x256xf32>
    %12 = vector.broadcast %11 : vector<1x256xf32> to vector<2x256xf32>
    %13 = vector.extract_strided_slice %2 {offsets = [3, 0], sizes = [1, 256], strides = [1, 1]} : vector<4x256xf32> to vector<1x256xf32>
    %14 = tpu.concatenate %6, %9, %12, %13 in 0 : vector<4x256xf32>, vector<3x256xf32>, vector<2x256xf32>, vector<1x256xf32> -> vector<10x256xf32>
    %15 = vector.extract_strided_slice %3 {offsets = [0, 0], sizes = [1, 256], strides = [1, 1]} : vector<4x256xf32> to vector<1x256xf32>
    %16 = vector.shape_cast %15 : vector<1x256xf32> to vector<1x256xf32>
    %17 = vector.broadcast %16 : vector<1x256xf32> to vector<4x256xf32>
    %18 = vector.extract_strided_slice %3 {offsets = [1, 0], sizes = [1, 256], strides = [1, 1]} : vector<4x256xf32> to vector<1x256xf32>
    %19 = vector.shape_cast %18 : vector<1x256xf32> to vector<1x256xf32>
    %20 = vector.broadcast %19 : vector<1x256xf32> to vector<3x256xf32>
    %21 = vector.extract_strided_slice %3 {offsets = [2, 0], sizes = [1, 256], strides = [1, 1]} : vector<4x256xf32> to vector<1x256xf32>
    %22 = vector.shape_cast %21 : vector<1x256xf32> to vector<1x256xf32>
    %23 = vector.broadcast %22 : vector<1x256xf32> to vector<2x256xf32>
    %24 = vector.extract_strided_slice %3 {offsets = [3, 0], sizes = [1, 256], strides = [1, 1]} : vector<4x256xf32> to vector<1x256xf32>
    %25 = tpu.concatenate %17, %20, %23, %24 in 0 : vector<4x256xf32>, vector<3x256xf32>, vector<2x256xf32>, vector<1x256xf32> -> vector<10x256xf32>
    %26 = vector.extract_strided_slice %2 {offsets = [1, 0], sizes = [3, 256], strides = [1, 1]} : vector<4x256xf32> to vector<3x256xf32>
    %27 = vector.extract_strided_slice %2 {offsets = [2, 0], sizes = [2, 256], strides = [1, 1]} : vector<4x256xf32> to vector<2x256xf32>
    %28 = vector.extract_strided_slice %2 {offsets = [3, 0], sizes = [1, 256], strides = [1, 1]} : vector<4x256xf32> to vector<1x256xf32>
    %29 = tpu.concatenate %2, %26, %27, %28 in 0 : vector<4x256xf32>, vector<3x256xf32>, vector<2x256xf32>, vector<1x256xf32> -> vector<10x256xf32>
    %30 = vector.extract_strided_slice %3 {offsets = [1, 0], sizes = [3, 256], strides = [1, 1]} : vector<4x256xf32> to vector<3x256xf32>
    %31 = vector.extract_strided_slice %3 {offsets = [2, 0], sizes = [2, 256], strides = [1, 1]} : vector<4x256xf32> to vector<2x256xf32>
    %32 = vector.extract_strided_slice %3 {offsets = [3, 0], sizes = [1, 256], strides = [1, 1]} : vector<4x256xf32> to vector<1x256xf32>
    %33 = tpu.concatenate %3, %30, %31, %32 in 0 : vector<4x256xf32>, vector<3x256xf32>, vector<2x256xf32>, vector<1x256xf32> -> vector<10x256xf32>
    %34 = arith.mulf %14, %29 : vector<10x256xf32>
    %35 = arith.mulf %25, %33 : vector<10x256xf32>
    %36 = arith.addf %34, %35 : vector<10x256xf32>
    %37 = vector.extract_strided_slice %2 {offsets = [0, 0], sizes = [1, 256], strides = [1, 1]} : vector<4x256xf32> to vector<1x256xf32>
    %38 = vector.shape_cast %37 : vector<1x256xf32> to vector<1x256xf32>
    %39 = vector.broadcast %38 : vector<1x256xf32> to vector<3x256xf32>
    %40 = vector.extract_strided_slice %2 {offsets = [1, 0], sizes = [1, 256], strides = [1, 1]} : vector<4x256xf32> to vector<1x256xf32>
    %41 = vector.shape_cast %40 : vector<1x256xf32> to vector<1x256xf32>
    %42 = vector.broadcast %41 : vector<1x256xf32> to vector<2x256xf32>
    %43 = vector.extract_strided_slice %2 {offsets = [2, 0], sizes = [1, 256], strides = [1, 1]} : vector<4x256xf32> to vector<1x256xf32>
    %44 = tpu.concatenate %39, %42, %43 in 0 : vector<3x256xf32>, vector<2x256xf32>, vector<1x256xf32> -> vector<6x256xf32>
    %45 = vector.extract_strided_slice %3 {offsets = [0, 0], sizes = [1, 256], strides = [1, 1]} : vector<4x256xf32> to vector<1x256xf32>
    %46 = vector.shape_cast %45 : vector<1x256xf32> to vector<1x256xf32>
    %47 = vector.broadcast %46 : vector<1x256xf32> to vector<3x256xf32>
    %48 = vector.extract_strided_slice %3 {offsets = [1, 0], sizes = [1, 256], strides = [1, 1]} : vector<4x256xf32> to vector<1x256xf32>
    %49 = vector.shape_cast %48 : vector<1x256xf32> to vector<1x256xf32>
    %50 = vector.broadcast %49 : vector<1x256xf32> to vector<2x256xf32>
    %51 = vector.extract_strided_slice %3 {offsets = [2, 0], sizes = [1, 256], strides = [1, 1]} : vector<4x256xf32> to vector<1x256xf32>
    %52 = tpu.concatenate %47, %50, %51 in 0 : vector<3x256xf32>, vector<2x256xf32>, vector<1x256xf32> -> vector<6x256xf32>
    %53 = vector.extract_strided_slice %2 {offsets = [1, 0], sizes = [3, 256], strides = [1, 1]} : vector<4x256xf32> to vector<3x256xf32>
    %54 = vector.extract_strided_slice %2 {offsets = [2, 0], sizes = [2, 256], strides = [1, 1]} : vector<4x256xf32> to vector<2x256xf32>
    %55 = vector.extract_strided_slice %2 {offsets = [3, 0], sizes = [1, 256], strides = [1, 1]} : vector<4x256xf32> to vector<1x256xf32>
    %56 = tpu.concatenate %53, %54, %55 in 0 : vector<3x256xf32>, vector<2x256xf32>, vector<1x256xf32> -> vector<6x256xf32>
    %57 = vector.extract_strided_slice %3 {offsets = [1, 0], sizes = [3, 256], strides = [1, 1]} : vector<4x256xf32> to vector<3x256xf32>
    %58 = vector.extract_strided_slice %3 {offsets = [2, 0], sizes = [2, 256], strides = [1, 1]} : vector<4x256xf32> to vector<2x256xf32>
    %59 = vector.extract_strided_slice %3 {offsets = [3, 0], sizes = [1, 256], strides = [1, 1]} : vector<4x256xf32> to vector<1x256xf32>
    %60 = tpu.concatenate %57, %58, %59 in 0 : vector<3x256xf32>, vector<2x256xf32>, vector<1x256xf32> -> vector<6x256xf32>
    %61 = arith.mulf %52, %56 : vector<6x256xf32>
    %62 = arith.mulf %44, %60 : vector<6x256xf32>
    %63 = arith.subf %61, %62 : vector<6x256xf32>
    %64 = vector.extract_strided_slice %1 {offsets = [0, 0], sizes = [1, 256], strides = [1, 1]} : vector<4x256xf32> to vector<1x256xf32>
    %cst = arith.constant 0.000000e+00 : f32
    %65 = vector.broadcast %cst : f32 to vector<3x256xf32>
    %66 = vector.extract_strided_slice %1 {offsets = [1, 0], sizes = [1, 256], strides = [1, 1]} : vector<4x256xf32> to vector<1x256xf32>
    %cst_1 = arith.constant 0.000000e+00 : f32
    %67 = vector.broadcast %cst_1 : f32 to vector<2x256xf32>
    %68 = vector.extract_strided_slice %1 {offsets = [2, 0], sizes = [1, 256], strides = [1, 1]} : vector<4x256xf32> to vector<1x256xf32>
    %cst_2 = arith.constant 0.000000e+00 : f32
    %69 = vector.broadcast %cst_2 : f32 to vector<1x256xf32>
    %70 = vector.extract_strided_slice %1 {offsets = [3, 0], sizes = [1, 256], strides = [1, 1]} : vector<4x256xf32> to vector<1x256xf32>
    %71 = tpu.concatenate %64, %65, %66, %67, %68, %69, %70 in 0 : vector<1x256xf32>, vector<3x256xf32>, vector<1x256xf32>, vector<2x256xf32>, vector<1x256xf32>, vector<1x256xf32>, vector<1x256xf32> -> vector<10x256xf32>
    %72 = arith.addf %36, %71 : vector<10x256xf32>
    %73 = vector.extract_strided_slice %72 {offsets = [0, 0], sizes = [1, 256], strides = [1, 1]} : vector<10x256xf32> to vector<1x256xf32>
    %74 = vector.extract_strided_slice %72 {offsets = [4, 0], sizes = [1, 256], strides = [1, 1]} : vector<10x256xf32> to vector<1x256xf32>
    %75 = arith.addf %73, %74 : vector<1x256xf32>
    %76 = vector.extract_strided_slice %72 {offsets = [7, 0], sizes = [1, 256], strides = [1, 1]} : vector<10x256xf32> to vector<1x256xf32>
    %77 = arith.addf %75, %76 : vector<1x256xf32>
    %78 = vector.extract_strided_slice %72 {offsets = [9, 0], sizes = [1, 256], strides = [1, 1]} : vector<10x256xf32> to vector<1x256xf32>
    %79 = arith.addf %77, %78 : vector<1x256xf32>
    %80 = tpu.concatenate %72, %63, %79 in 0 : vector<10x256xf32>, vector<6x256xf32>, vector<1x256xf32> -> vector<17x256xf32>
    %c0_3 = arith.constant 0 : index
    %c0_4 = arith.constant 0 : index
    %81 = vector.load %arg2[%c0_3, %c0_4] : memref<17x256xf32, #tpu.memory_space<vmem>>, vector<17x256xf32>
    tpu.vector_store %arg2[%c0_3, %c0_4], %80 {strides = array<i32>} : memref<17x256xf32, #tpu.memory_space<vmem>>, vector<17x256xf32>,
    return
  }
  func.func @transform_0(%arg0: i32) -> (i32, i32) {
    %c0_i32 = arith.constant 0 : i32
    %c0_i32_0 = arith.constant 0 : i32
    return %c0_i32, %arg0 : i32, i32
  }
  func.func @transform_1(%arg0: i32) -> (i32, i32) {
    %c0_i32 = arith.constant 0 : i32
    %c0_i32_0 = arith.constant 0 : i32
    return %c0_i32, %arg0 : i32, i32
  }
}

</mosaic_0001>

<bundles_post_ra>
// kernel: tpu_custom_call.1
= control target key start
LH: loop header
LB: loop body
LE: loop exit
PB: predicated region body
PF: predicated region fallthrough
CT: control target
= control target key end

     0   :  { %6 = vsyncpa [#allocation3], 0  ;;  %s879_s0 = inlined_call_operand.hbm [shape: f32[12,512], index: 0, kind: input, shape index: {}]   ;;  %s880_s1 = inlined_call_operand.hbm [shape: f32[17,512], index: 1, kind: output, shape index: {}]  }
   0x1   :  { %8 = vsyncpa [#allocation3 + $0x1], 0 }
   0x2   :  { %9 = vsyncpa [#allocation4], 0 }
   0x3   :  { %11 = vsyncpa [#allocation4 + $0x1], 0  ;;  %s583_s6 = smov 0   ;;  %s585_s7 = smov 0  }
   0x4   :  { %s587_s8 = smov 0   ;;  %s589_s9 = smov 0  }
   0x5 LB: > { %s604_s10 = sadd.s32 4294967295, %s565_s9   ;;  %s402_s11 = sadd.s32 4294967294, %s565_s9   ;;  %s565_s9 = sphi %s589_s9, %s889_s9   ;;  %s561_s8 = sphi %s587_s8, %s888_s8   ;;  %s557_s7 = sphi %s585_s7, %s887_s7   ;;  %s553_s6 = sphi %s583_s6, %s886_s6  }
   0x6   : > { %s608_s12 = sadd.s32 1, %s565_s9   ;;  %s24_s13 = sadd.s32 1, %s561_s8 }
   0x7   : > { %s21_s14 = ssub.s32 %s565_s9, %s608_s12  ;;  %p31_p0 = scmp.ne.s32.totalorder %s561_s8, %s557_s7 }
   0x8   : > { %p22_p1 = scmp.eq.s32.totalorder %s21_s14, 0  ;;  %p32_p2 = scmp.eq.s32.totalorder %s565_s9, 0 }
   0x9   : > { %p37_p3 = scmp.ne.s32.totalorder %s557_s7, %s553_s6  ;;  %p38_p4 = scmp.eq.s32.totalorder %s604_s10, 0 }
   0xa   : > { %s620_s15 = scalar_select %p22_p1, %s561_s8, %s24_s13  }
   0xb   : > { %p622_p5 = por %p32_p2, %p31_p0  ;;  %p626_p6 = por %p38_p4, %p37_p3 }
   0xc   : > { %p61_p7 = scmp.eq.s32.totalorder %s604_s10, 1  ;;  %p67_p8 = scmp.eq.s32.totalorder %s402_s11, 1 }
   0xd   : > { %p404_p9 = scmp.ge.s32.totalorder %s565_s9, 2  ;;  %p429_p10 = scmp.lt.s32.totalorder %s565_s9, 2 }
   0xe   : > { %p633_p11 = por %p61_p7, %p31_p0  ;;  %p637_p12 = por %p67_p8, %p37_p3 }
   0xf   : > { %s87_s20 = sand.u32 1, %s561_s8   ;;  %s414_s21 = sshll.u32 %s565_s9, 4 }
  0x10   : > { %s405_s22 = sshll.u32 %s87_s20, 5  ;;  %s96_s25 = scalar_lea.hbm %s879_s0, %s414_s21 }
  0x11   : > { %s97_s26 = sshll.u32 %s96_s25, 4  ;;  %s91_s27 = scalar_lea.vmem [#allocation2], %s405_s22  ;;  %s98_s26 = int_to_ptr.hbm [resolvable:$true] %s97_s26 }
  0x12   : > { %s99_s28 = sshll.u32 %s91_s27, 4  ;;  %p648_p13 = pnand %p429_p10, %p622_p5  ;;  %s100_s28 = int_to_ptr.vmem [resolvable:$true] %s99_s28 }
  0x13   : > { %p408_p0 = scmp.ge.s32.totalorder %s565_s9, 1  ;;  %s88_s30 = scalar_lea.sflag [#allocation3], %s87_s20 }
  0x14   : > { %s469_s2 = sshra.s32 %s98_s26, 4  ;;  %p473_p2 = pneg %p648_p13  ;;  %s470_s2 = int_to_ptr.hbm [resolvable:$true] %s469_s2 }
  0x15   : > { %s471_s3 = scalar_lea.hbm %s470_s2, 32  ;;  %s476_s11 = scalar_lea.hbm %s879_s0, 64 }
  0x16   : > { %p472_p1 = scmp.ne.s32.totalorder %s470_s2, %s471_s3  ;;  %p477_p5 = scmp.lt.s32.totalorder %s470_s2, %s879_s0 }
  0x17   : > { %p478_p7 = scmp.lt.s32.totalorder %s476_s11, %s471_s3 }
  0x18   : > { %p474_p3 = pnand %p473_p2, %p472_p1 }
  0x19   : > { %p479_p8 = por %p478_p7, %p477_p5 }
  0x1a   : > { %p475_p4 = pneg %p474_p3 }
  0x1c   : > { %p480_p10 = pnand %p479_p8, %p475_p4 }
  0x1e   : > { %483 = shalt.err (!%p480_p10)
}
  0x1f   : > { %s567_s16 = smov 512   ;;  %s568_s20 = smov 256  }
  0x20   : > { %s569_s21 = smov 16   ;;  %p107_p1 = scmp.lt.s32.totalorder %s565_s9, 3 }
  0x21   : > { %424 = dma.hbm_to_vmem [thread:$0]  (!%p648_p13), %s98_s26, 512, %s100_s28, %s88_s30, %s567_s16, %s568_s20, %s569_s21  }
  0x22   : > { %p108_p2 = pnand %p408_p0, %p107_p1 }
  0x23   : > { %s667_s22 = sand.u32 (!%p108_p2), 1, %s557_s7  }
  0x24   : > { %111 = sbr.rel (%p108_p2) target bundleno = 83 (0x53), region = 24  ;;  %s409_s23 = sshll.u32 (!%p108_p2), %s667_s22, 5 }
  0x25   : > { %s114_s24 = scalar_lea.sflag (!%p108_p2), [#allocation3], %s667_s22  ;;  %s671_s25 = scalar_lea.vmem (!%p108_p2), [#allocation2], %s409_s23 }
  0x29   : > { %544 = dma.done.wait (%p626_p6), %s114_s24, 512  }
  0x2a   : > { %546 = vsyncadd (%p626_p6), %s114_s24, 4294966784  ;;  %v678_v0 = vld [vmem:[%s671_s25] sm:$0xff]  ;;  %vm155_vm0 = vcmask 1043456   ;;  %vm158_vm1 = vcmask 1046528   ;;  %vm161_vm2 = vcmask 1040384   ;;  %vm227_vm3 = vcmask 1044480  }
  0x2b   : > { %v681_v1 = vld [vmem:[%s671_s25 + $0x10] sm:$0xf]  ;;  %v143_v2 = vperm.slane %v678_v0, 0  ;;  %v145_v3 = vperm.slane %v678_v0, 1  ;;  %v147_v4 = vperm.slane %v678_v0, 2  ;;  %v164_v5 = vperm.slane %v678_v0, 4 }
  0x2c   : > { %v166_v6 = vperm.slane %v678_v0, 5  ;;  %v168_v7 = vperm.slane %v678_v0, 6  ;;  %v690_v8 = vrot.slane %v678_v0, 5  ;;  %v693_v9 = vrot.slane %v678_v0, 3  ;;  %v704_v14 = vld [vmem:[%s671_s25 + $0x8] sm:$0xff]  ;;  %s416_s17 = smul.u32 48, %s667_s22 }
  0x2d   : > { %v156_v10 = vsel %vm155_vm0, %v143_v2, %v145_v3  ;;  %v194_v11 = vrot.slane %v678_v0, 4  ;;  %v698_v12 = vrot.slane %v678_v0, 1  ;;  %v701_v13 = vrot.slane %v678_v0, 7  ;;  %v741_v37 = vld [vmem:[%s671_s25 + $0x18] sm:$0xf]  ;;  %s415_s27 = sshll.u32 %s604_s10, 4 }
  0x2e   : > { %vm224_vm4 = vcmask 1042432   ;;  %v159_v15 = vsel %vm158_vm1, %v156_v10, %v147_v4  ;;  %v174_v16 = vsel %vm155_vm0, %v164_v5, %v166_v6  ;;  %v188_v17 = vsel %vm155_vm0, %v678_v0, %v690_v8  ;;  %s768_s26 = scalar_lea.vmem [#allocation5], %s416_s17  ;;  %s325_s29 = scalar_lea.hbm %s880_s1, %s415_s27 }
  0x2f   : > { %v250_v18 = vrot.slane %v681_v1, 5  ;;  %v176_v19 = vsel %vm158_vm1, %v174_v16, %v168_v7  ;;  %v190_v20 = vsel %vm158_vm1, %v188_v17, %v693_v9  ;;  %v206_v21 = vsel %vm155_vm0, %v194_v11, %v698_v12  ;;  %s326_s30 = sshll.u32 %s768_s26, 4  ;;  %s328_s2 = sshll.u32 %s325_s29, 4  ;;  %s327_s30 = int_to_ptr.vmem [resolvable:$true] %s326_s30  ;;  %s329_s2 = int_to_ptr.hbm [resolvable:$true] %s328_s2 }
  0x30   : > { %v254_v22 = vrot.slane %v681_v1, 3  ;;  %v208_v23 = vsel %vm158_vm1, %v206_v21, %v701_v13  ;;  %v212_v24 = vmul.f32 %v190_v20, %v159_v15  ;;  %v262_v25 = vsel %vm161_vm2, %v681_v1, 0.0  ;;  %s314_s3 = scalar_lea.sflag [#allocation4], %s667_s22  ;;  %s513_s4 = sshra.s32 %s329_s2, 4  ;;  %s514_s4 = int_to_ptr.hbm [resolvable:$true] %s513_s4 }
  0x31   : > { %v144_v26 = vperm.slane %v704_v14, 0  ;;  %v216_v27 = vmul.f32 %v208_v23, %v176_v19  ;;  %v264_v28 = vsel %vm155_vm0, %v262_v25, %v250_v18  ;;  %v146_v29 = vperm.slane %v704_v14, 1  ;;  %s515_s5 = scalar_lea.hbm %s514_s4, 48  ;;  %s519_s14 = scalar_lea.hbm %s880_s1, 96 }
  0x32   : > { %v148_v30 = vperm.slane %v704_v14, 2  ;;  %v266_v31 = vsel %vm227_vm3, %v264_v28, 0.0  ;;  %v165_v32 = vperm.slane %v704_v14, 4  ;;  %v167_v33 = vperm.slane %v704_v14, 5  ;;  %p516_p6 = scmp.ne.s32.totalorder %s514_s4, %s515_s5  ;;  %p520_p3 = scmp.lt.s32.totalorder %s514_s4, %s880_s1 }
  0x33   : > { %v169_v34 = vperm.slane %v704_v14, 6  ;;  %v220_v35 = vadd.f32 %v216_v27, %v212_v24  ;;  %v268_v36 = vsel %vm158_vm1, %v266_v31, %v254_v22  ;;  %v157_v38 = vsel %vm155_vm0, %v144_v26, %v146_v29  ;;  %p521_p4 = scmp.lt.s32.totalorder %s519_s14, %s515_s5 }
  0x34   : > { %v747_v39 = vrot.slane %v704_v14, 5  ;;  %v160_v40 = vsel %vm158_vm1, %v157_v38, %v148_v30  ;;  %v175_v41 = vsel %vm155_vm0, %v165_v32, %v167_v33  ;;  %v185_v42 = vrot.slane %v704_v14, 3  ;;  %p517_p13 = pnand %p516_p6, %p633_p11 }
  0x35   : > { %v195_v43 = vrot.slane %v704_v14, 4  ;;  %v755_v44 = vadd.f32 %v268_v36, %v220_v35  ;;  %v177_v45 = vsel %vm158_vm1, %v175_v41, %v169_v34  ;;  %v199_v47 = vrot.slane %v704_v14, 1  ;;  %p522_p5 = por %p521_p4, %p520_p3 }
  0x36   : > { %v189_v46 = vsel %vm155_vm0, %v704_v14, %v747_v39  ;;  %v203_v49 = vrot.slane %v704_v14, 7  ;;  %v251_v50 = vrot.slane %v741_v37, 5  ;;  %v255_v51 = vrot.slane %v741_v37, 3  ;;  %p518_p0 = pneg %p517_p13 }
  0x37   : > { %v191_v48 = vsel %vm158_vm1, %v189_v46, %v185_v42  ;;  %307 = vst [vmem:[%s768_s26] sm:$0xff] %v755_v44  ;;  %v207_v52 = vsel %vm155_vm0, %v195_v43, %v199_v47  ;;  %v263_v54 = vsel %vm161_vm2, %v741_v37, 0.0  ;;  %v151_v55 = vrot.slane %v678_v0, 2 }
  0x38   : > { %v213_v53 = vmul.f32 %v191_v48, %v160_v40  ;;  %v209_v56 = vsel %vm158_vm1, %v207_v52, %v203_v49  ;;  %v265_v57 = vsel %vm155_vm0, %v263_v54, %v251_v50  ;;  %v170_v58 = vrot.slane %v678_v0, 6  ;;  %p523_p7 = pnand %p522_p5, %p518_p0 }
  0x39   : > { %v225_v59 = vsel %vm224_vm4, %v143_v2, %v145_v3  ;;  %v217_v60 = vmul.f32 %v209_v56, %v177_v45  ;;  %v267_v61 = vsel %vm227_vm3, %v265_v57, 0.0  ;;  %v162_v62 = vsel %vm161_vm2, %v147_v4, %v151_v55 }
  0x3a   : > { %v192_v63 = vsel %vm161_vm2, %v693_v9, %v151_v55  ;;  %vm304_vm5 = vcmask 1041408   ;;  %v269_v10 = vsel %vm158_vm1, %v267_v61, %v255_v51  ;;  %v178_v11 = vsel %vm161_vm2, %v168_v7, %v170_v58 }
  0x3b   : > { %v210_v2 = vsel %vm161_vm2, %v701_v13, %v170_v58  ;;  %v214_v3 = vmul.f32 %v192_v63, %v162_v62  ;;  %v221_v15 = vadd.f32 %v217_v60, %v213_v53  ;;  %v228_v4 = vsel %vm227_vm3, %v225_v59, %v690_v8 }
  0x3c   : > { %v218_v16 = vmul.f32 %v210_v2, %v178_v11  ;;  %v230_v17 = vsel %vm224_vm4, %v164_v5, %v166_v6  ;;  %v234_v7 = vsel %vm224_vm4, %v698_v12, %v701_v13  ;;  %v238_v19 = vsel %vm224_vm4, %v690_v8, %v693_v9 }
  0x3d   : > { %v232_v18 = vsel %vm227_vm3, %v230_v17, %v698_v12  ;;  %v258_v20 = vrot.slane %v681_v1, 2  ;;  %v273_v21 = vadd.f32 %v269_v10, %v221_v15  ;;  %v236_v23 = vsel %vm227_vm3, %v234_v7, %v170_v58 }
  0x3e   : > { %v222_v22 = vadd.f32 %v218_v16, %v214_v3  ;;  %v240_v0 = vsel %vm227_vm3, %v238_v19, %v151_v55  ;;  %v242_v5 = vmul.f32 %v236_v23, %v232_v18  ;;  %v152_v25 = vrot.slane %v704_v14, 2 }
  0x3f   : > { %v244_v6 = vmul.f32 %v240_v0, %v228_v4  ;;  %v270_v24 = vsel %vm161_vm2, 0.0, %v258_v20  ;;  %308 = vst [vmem:[%s768_s26 + $0x8] sm:$0xff] %v273_v21  ;;  %v171_v13 = vrot.slane %v704_v14, 6  ;;  %v226_v1 = vsel %vm224_vm4, %v144_v26, %v146_v29 }
  0x40   : > { %v274_v12 = vadd.f32 %v270_v24, %v222_v22  ;;  %v231_v8 = vsel %vm224_vm4, %v165_v32, %v167_v33  ;;  %v163_v27 = vsel %vm161_vm2, %v148_v30, %v152_v25  ;;  %v193_v28 = vsel %vm161_vm2, %v185_v42, %v152_v25 }
  0x41   : > { %v246_v9 = vsub.f32 %v242_v5, %v244_v6  ;;  %v229_v31 = vsel %vm227_vm3, %v226_v1, %v747_v39  ;;  %v179_v35 = vsel %vm161_vm2, %v169_v34, %v171_v13  ;;  %v211_v36 = vsel %vm161_vm2, %v203_v49, %v171_v13 }
  0x42   : > { %v215_v26 = vmul.f32 %v193_v28, %v163_v27  ;;  %v233_v29 = vsel %vm227_vm3, %v231_v8, %v199_v47  ;;  %v219_v33 = vmul.f32 %v211_v36, %v179_v35  ;;  %v235_v38 = vsel %vm224_vm4, %v199_v47, %v203_v49 }
  0x43   : > { %v300_v32 = vrot.slane %v246_v9, 6  ;;  %v239_v30 = vsel %vm224_vm4, %v747_v39, %v185_v42  ;;  %v237_v40 = vsel %vm227_vm3, %v235_v38, %v171_v13  ;;  %v259_v34 = vrot.slane %v741_v37, 2 }
  0x44   : > { %v241_v14 = vsel %vm227_vm3, %v239_v30, %v152_v25  ;;  %v278_v41 = vrot.slane %v755_v44, 4  ;;  %v223_v45 = vadd.f32 %v219_v33, %v215_v26  ;;  %v243_v46 = vmul.f32 %v237_v40, %v233_v29 }
  0x45   : > { %v305_v43 = vsel %vm304_vm5, %v274_v12, %v300_v32  ;;  %v245_v48 = vmul.f32 %v241_v14, %v229_v31  ;;  %v271_v47 = vsel %vm161_vm2, 0.0, %v259_v34  ;;  %v284_v42 = vrot.slane %v755_v44, 7 }
  0x46   : > { %309 = vst [vmem:[%s768_s26 + $0x10] sm:$0xff] %v305_v43  ;;  %v282_v39 = vadd.f32 %v278_v41, %v755_v44  ;;  %v292_v49 = vrot.slane %v274_v12, 1  ;;  %v275_v50 = vadd.f32 %v271_v47, %v223_v45  ;;  %v279_v51 = vrot.slane %v273_v21, 4 }
  0x47   : > { %v247_v37 = vsub.f32 %v243_v46, %v245_v48  ;;  %v285_v52 = vrot.slane %v273_v21, 7 }
  0x48   : > { %v288_v53 = vadd.f32 %v284_v42, %v282_v39  ;;  %v283_v55 = vadd.f32 %v279_v51, %v273_v21  ;;  %v293_v56 = vrot.slane %v275_v50, 1 }
  0x49   : > { %v301_v54 = vrot.slane %v247_v37, 6 }
  0x4a   : > { %v296_v44 = vadd.f32 %v292_v49, %v288_v53  ;;  %v289_v58 = vadd.f32 %v285_v52, %v283_v55 }
  0x4b   : > { %v306_v57 = vsel %vm304_vm5, %v275_v50, %v301_v54 }
  0x4c   : > { %310 = vst [vmem:[%s768_s26 + $0x18] sm:$0xff] %v306_v57  ;;  %v297_v59 = vadd.f32 %v293_v56, %v289_v58 }
  0x4d   : > { %311 = vst [vmem:[%s768_s26 + $0x20] sm:$0x1] %v296_v44 }
  0x4e   : > { %312 = vst [vmem:[%s768_s26 + $0x28] sm:$0x1] %v297_v59 }
  0x4f   : > { %526 = shalt.err (!%p523_p7)
}
  0x50   : > { %s570_s21 = smov 256   ;;  %s571_s22 = smov 512  }
  0x51   : > { %s572_s23 = smov 16  }
  0x52   : > { %419 = dma.vmem_to_hbm [thread:$0]  (%p633_p11), %s327_s30, 768, %s329_s2, %s314_s3, %s570_s21, %s571_s22, %s572_s23  }
  0x53 PF: > { %s343_s24 = sand.u32 1, %s553_s6   ;;  %p426_p8 = pnand %p404_p9, %p637_p12 }
  0x54   : > { %s344_s25 = scalar_lea.sflag [#allocation4], %s343_s24 }
  0x55   : > { %p427_p10 = pneg %p426_p8 }
  0x57   : > { %548 = dma.done.wait (%p427_p10), %s344_s25, 768  }
  0x58   : > { %550 = vsyncadd (%p427_p10), %s344_s25, 4294966528  ;;  %p14_p1 = scmp.ge.s32.totalorder %s608_s12, 4   ;;  %s886_s6 = smov %s557_s7 }
  0x59   : > { %s887_s7 = smov %s561_s8  ;;  %s888_s8 = smov %s620_s15 }
  0x5a   : > { %s889_s9 = smov %s608_s12  ;;  %16 = sbr.rel (!%p14_p1) target bundleno = 5 (0x5), region = 69 }
  0x5f   :  { %350 = vsyncpa [#allocation3], 1 }
  0x60   :  { %352 = vsyncpa [#allocation3 + $0x1], 1 }
  0x61   :  { %353 = vsyncpa [#allocation4], 1 }
  0x62   :  { %355 = vsyncpa [#allocation4 + $0x1], 1 }

</bundles_post_ra>
